<compile_context>
chip_gen: v7x
topology: tpu7x:2x2x1
jax: 0.10.0
libtpu: 0.0.40
codegen_flags: <defaults>
</compile_context>

<pallas_src>
import jax
import jax.numpy as jnp
from jax.experimental import pallas as pl
from jax.experimental.pallas import tpu as pltpu

_LANE = 128            # TPU lane width (final-layer padding for the small path)
_GRID_THRESHOLD = 1024  # below this: single resident block (no grid)
_SUB_TILE_MIN = 512     # batch tiles >= this are split into 4 MXU sub-chains


def _make_kernel(tile_rows, n_sub):
    """Fused 3-layer MLP over one (tile_rows, in_features) batch block.

    Weights arrive pre-transposed (in, out) in bf16; biases / accumulation are
    f32.  With n_sub > 1 the batch block is processed as independent sub-tiles
    in an unrolled fori_loop so consecutive matmul chains overlap on the MXU.
    """
    sub_rows = tile_rows // n_sub

    def kernel(x_ref, w1_ref, b1_ref, w2_ref, b2_ref, w3_ref, b3_ref, o_ref):
        w1 = w1_ref[...]
        w2 = w2_ref[...]
        w3 = w3_ref[...]
        # Hoist bias broadcasts out of the sub-tile loop (JAX does not CSE
        # broadcast_in_dim; the VALU has huge slack so the adds are free).
        b1 = jnp.broadcast_to(b1_ref[...], (sub_rows, b1_ref.shape[-1]))
        b2 = jnp.broadcast_to(b2_ref[...], (sub_rows, b2_ref.shape[-1]))
        b3 = jnp.broadcast_to(b3_ref[...], (sub_rows, b3_ref.shape[-1]))

        def chain(row0):
            xb = x_ref[pl.ds(row0, sub_rows), :].astype(jnp.bfloat16)
            h1 = jnp.dot(xb, w1, preferred_element_type=jnp.float32)
            h1 = jnp.maximum(h1 + b1, 0.0).astype(jnp.bfloat16)
            h2 = jnp.dot(h1, w2, preferred_element_type=jnp.float32)
            h2 = jnp.maximum(h2 + b2, 0.0).astype(jnp.bfloat16)
            y = jnp.dot(h2, w3, preferred_element_type=jnp.float32) + b3
            o_ref[pl.ds(row0, sub_rows), :] = y.astype(o_ref.dtype)

        if n_sub == 1:
            chain(0)
        else:
            def body(s, carry):
                chain(pl.multiple_of(s * sub_rows, sub_rows))
                return carry
            jax.lax.fori_loop(0, n_sub, body, 0, unroll=True)

    return kernel


def prepare_params(params):
    """One-time parameter prep (do NOT call per forward):
       - transpose PyTorch-style (out, in) weights to (in, out) and cast to bf16
       - keep biases in f32 as (1, out) rows
       - also build a lane-padded (128-wide) copy of the final layer for the
         small-batch resident path (unmasked lane-dense output store)."""
    out_size = int(params["W3"].shape[0])
    padded_out = -(-out_size // _LANE) * _LANE

    def t_bf16(w):
        return jnp.asarray(w).T.astype(jnp.bfloat16)

    w3t = t_bf16(params["W3"])                                   # (h2, out)
    w3t_pad = jnp.pad(w3t, ((0, 0), (0, padded_out - out_size)))
    b3 = jnp.asarray(params["b3"]).astype(jnp.float32)

    return {
        "W1t": t_bf16(params["W1"]),                             # (in, h1)
        "W2t": t_bf16(params["W2"]),                             # (h1, h2)
        "W3t": w3t,
        "W3t_pad": w3t_pad,
        "b1": jnp.asarray(params["b1"]).astype(jnp.float32).reshape(1, -1),
        "b2": jnp.asarray(params["b2"]).astype(jnp.float32).reshape(1, -1),
        "b3": b3.reshape(1, -1),
        "b3_pad": jnp.pad(b3, (0, padded_out - out_size)).reshape(1, -1),
        "out_size": out_size,
        "padded_out": padded_out,
    }


def _forward_resident(x, prepped):
    """Small-batch path: whole batch in one VMEM-resident block, no grid."""
    B = x.shape[0]
    padded_out = prepped["padded_out"]
    vmem = lambda: pl.BlockSpec(memory_space=pltpu.MemorySpace.VMEM)
    kernel = _make_kernel(B, 1)
    y_pad = pl.pallas_call(
        kernel,
        out_shape=jax.ShapeDtypeStruct((B, padded_out), jnp.float32),
        in_specs=[vmem() for _ in range(7)],
        out_specs=vmem(),
    )(x, prepped["W1t"], prepped["b1"], prepped["W2t"], prepped["b2"],
      prepped["W3t_pad"], prepped["b3_pad"])
    # Padded columns are exact zeros (zero weights + zero bias); slice fuses
    # with the consumer under jit.
    return y_pad[:, :prepped["out_size"]]


def _forward_gridded(x, prepped):
    """Large-batch path: 1-D batch grid, VMEM-resident weights, unpadded output."""
    B, in_dim = x.shape
    out_size = prepped["out_size"]
    h1 = prepped["W1t"].shape[1]
    h2 = prepped["W2t"].shape[1]

    # Large batch tiles amortize the ~0.35 us per-grid-step cost.
    if B >= 4096:
        tile = 2048
    elif B >= 2048:
        tile = 1024
    else:
        tile = 512
    n_sub = 4 if tile >= _SUB_TILE_MIN else 1

    B_pad = -(-B // tile) * tile
    x_in = x if B_pad == B else jnp.pad(x, ((0, B_pad - B), (0, 0)))
    n_steps = B_pad // tile

    const = lambda shape: pl.BlockSpec(shape, lambda i: (0, 0))
    kernel = _make_kernel(tile, n_sub)
    y = pl.pallas_call(
        kernel,
        out_shape=jax.ShapeDtypeStruct((B_pad, out_size), jnp.float32),
        grid=(n_steps,),
        in_specs=[
            pl.BlockSpec((tile, in_dim), lambda i: (i, 0)),   # x: batch-tiled
            const((in_dim, h1)), const((1, h1)),              # weights/biases:
            const((h1, h2)), const((1, h2)),                  # constant index_map
            const((h2, out_size)), const((1, out_size)),      # -> DMA'd once, resident
        ],
        # Emit the true (B, out) width: masked store is a constant per-tile
        # cost vs padded writeback that scales with B; no trailing slice op.
        out_specs=pl.BlockSpec((tile, out_size), lambda i: (i, 0)),
        compiler_params=pltpu.CompilerParams(
            dimension_semantics=("parallel",),   # v7x: split batch tiles across TCs
        ),
    )(x_in, prepped["W1t"], prepped["b1"], prepped["W2t"], prepped["b2"],
      prepped["W3t"], prepped["b3"])
    return y if B_pad == B else y[:B, :]


def fnn_forward(x, prepped):
    """x: (B, input_size) float32. prepped: output of prepare_params."""
    if x.shape[0] < _GRID_THRESHOLD:
        return _forward_resident(x, prepped)
    return _forward_gridded(x, prepped)


def init_params(key, input_size, hidden_sizes, output_size):
    """Deterministic PyTorch-Linear-style init (uniform +/- 1/sqrt(fan_in)),
    stored PyTorch-style as W: (out_features, in_features)."""
    sizes = [input_size] + list(hidden_sizes) + [output_size]
    params = {}
    for i, (fan_in, fan_out) in enumerate(zip(sizes[:-1], sizes[1:]), start=1):
        key, kw, kb = jax.random.split(key, 3)
        bound = 1.0 / (fan_in ** 0.5)
        params[f"W{i}"] = jax.random.uniform(
            kw, (fan_out, fan_in), jnp.float32, minval=-bound, maxval=bound)
        params[f"b{i}"] = jax.random.uniform(
            kb, (fan_out,), jnp.float32, minval=-bound, maxval=bound)
    return params


def fnn_reference(x, params, dot_dtype=jnp.float32):
    """Plain-JAX reference (PyTorch-style params).
    dot_dtype=float32  -> module semantics.
    dot_dtype=bfloat16 -> matches the kernel's bf16-input / f32-accum arithmetic."""
    def dense(a, w, b):
        return jnp.dot(a.astype(dot_dtype), jnp.asarray(w).T.astype(dot_dtype),
                       preferred_element_type=jnp.float32) + b
    h = jnp.maximum(dense(x, params["W1"], params["b1"]), 0.0)
    h = jnp.maximum(dense(h, params["W2"], params["b2"]), 0.0)
    return dense(h, params["W3"], params["b3"])


if __name__ == "__main__":
    # F_NN(input_size=4, output_size=3, hidden_sizes=[32, 32]).
    input_size, hidden_sizes, output_size = 4, (32, 32), 3

    key = jax.random.PRNGKey(0)
    key, kp = jax.random.split(key)
    params = init_params(kp, input_size, hidden_sizes, output_size)
    prepped = prepare_params(params)   # one-time transpose + bf16 cast + padding

    fwd = jax.jit(lambda xx: fnn_forward(xx, prepped))

    # Exercise all paths: resident (128), gridded w/ batch padding (1000),
    # gridded exact-multiple with 1024-row tiles (2048).
    for batch in (128, 1000, 2048):
        key, kx = jax.random.split(key)
        x = jax.random.normal(kx, (batch, input_size), jnp.float32)
        y = jax.block_until_ready(fwd(x))
        assert y.shape == (batch, output_size)

        # Tight check vs a matched-precision reference (bf16 dot inputs, f32 accum).
        y_match = fnn_reference(x, params, dot_dtype=jnp.bfloat16)
        assert jnp.allclose(y, y_match, atol=2e-3, rtol=2e-3), \
            f"mismatch vs matched-precision reference at B={batch}"

        # Sanity check vs full-f32 module semantics (tolerance reflects bf16 MXU inputs).
        y_f32 = fnn_reference(x, params, dot_dtype=jnp.float32)
        assert jnp.allclose(y, y_f32, atol=1e-1, rtol=2e-2), \
            f"mismatch vs f32 reference at B={batch}"

    print("KERNEL_OK")
</pallas_src>

<mosaic_0001>
module attributes {stable_mosaic.version = 11 : i64} {
  func.func @kernel(%arg0: memref<128x4xf32, #tpu.memory_space<vmem>>, %arg1: memref<4x32xbf16, #tpu.memory_space<vmem>>, %arg2: memref<1x32xf32, #tpu.memory_space<vmem>>, %arg3: memref<32x32xbf16, #tpu.memory_space<vmem>>, %arg4: memref<1x32xf32, #tpu.memory_space<vmem>>, %arg5: memref<32x128xbf16, #tpu.memory_space<vmem>>, %arg6: memref<1x128xf32, #tpu.memory_space<vmem>>, %arg7: memref<128x128xf32, #tpu.memory_space<vmem>>) attributes {dimension_semantics = [], scalar_prefetch = 0 : i64, scratch_operands = 0 : i64, tpu.core_type = #tpu.core_type<tc>} {
    %c0 = arith.constant 0 : index
    %c0_0 = arith.constant 0 : index
    %0 = vector.load %arg1[%c0, %c0_0] : memref<4x32xbf16, #tpu.memory_space<vmem>>, vector<4x32xbf16>
    %c0_1 = arith.constant 0 : index
    %c0_2 = arith.constant 0 : index
    %1 = vector.load %arg3[%c0_1, %c0_2] : memref<32x32xbf16, #tpu.memory_space<vmem>>, vector<32x32xbf16>
    %c0_3 = arith.constant 0 : index
    %c0_4 = arith.constant 0 : index
    %2 = vector.load %arg5[%c0_3, %c0_4] : memref<32x128xbf16, #tpu.memory_space<vmem>>, vector<32x128xbf16>
    %c0_5 = arith.constant 0 : index
    %c0_6 = arith.constant 0 : index
    %3 = vector.load %arg2[%c0_5, %c0_6] : memref<1x32xf32, #tpu.memory_space<vmem>>, vector<1x32xf32>
    %4 = vector.shape_cast %3 : vector<1x32xf32> to vector<1x32xf32>
    %5 = vector.broadcast %4 : vector<1x32xf32> to vector<128x32xf32>
    %c0_7 = arith.constant 0 : index
    %c0_8 = arith.constant 0 : index
    %6 = vector.load %arg4[%c0_7, %c0_8] : memref<1x32xf32, #tpu.memory_space<vmem>>, vector<1x32xf32>
    %7 = vector.shape_cast %6 : vector<1x32xf32> to vector<1x32xf32>
    %8 = vector.broadcast %7 : vector<1x32xf32> to vector<128x32xf32>
    %c0_9 = arith.constant 0 : index
    %c0_10 = arith.constant 0 : index
    %9 = vector.load %arg6[%c0_9, %c0_10] : memref<1x128xf32, #tpu.memory_space<vmem>>, vector<1x128xf32>
    %10 = vector.shape_cast %9 : vector<1x128xf32> to vector<1x128xf32>
    %11 = vector.broadcast %10 : vector<1x128xf32> to vector<128x128xf32>
    %c0_11 = arith.constant 0 : index
    %c0_12 = arith.constant 0 : index
    %12 = vector.load %arg0[%c0_11, %c0_12] : memref<128x4xf32, #tpu.memory_space<vmem>>, vector<128x4xf32>
    %13 = arith.truncf %12 : vector<128x4xf32> to vector<128x4xbf16>
    %cst = arith.constant dense<0.000000e+00> : vector<128x32xf32>
    %14 = tpu.matmul %13, %0, %cst {dimension_numbers = #tpu.dot_dimension_numbers<[1], [0], [0], [1], [0, 0, 1, 1], [], []>} : vector<128x4xbf16>, vector<4x32xbf16>, vector<128x32xf32> -> vector<128x32xf32>
    %15 = arith.addf %14, %5 : vector<128x32xf32>
    %cst_13 = arith.constant 0.000000e+00 : f32
    %16 = vector.broadcast %cst_13 : f32 to vector<128x32xf32>
    %17 = arith.maximumf %15, %16 : vector<128x32xf32>
    %18 = arith.truncf %17 : vector<128x32xf32> to vector<128x32xbf16>
    %cst_14 = arith.constant dense<0.000000e+00> : vector<128x32xf32>
    %19 = tpu.matmul %18, %1, %cst_14 {dimension_numbers = #tpu.dot_dimension_numbers<[1], [0], [0], [1], [0, 0, 1, 1], [], []>} : vector<128x32xbf16>, vector<32x32xbf16>, vector<128x32xf32> -> vector<128x32xf32>
    %20 = arith.addf %19, %8 : vector<128x32xf32>
    %cst_15 = arith.constant 0.000000e+00 : f32
    %21 = vector.broadcast %cst_15 : f32 to vector<128x32xf32>
    %22 = arith.maximumf %20, %21 : vector<128x32xf32>
    %23 = arith.truncf %22 : vector<128x32xf32> to vector<128x32xbf16>
    %cst_16 = arith.constant dense<0.000000e+00> : vector<128x128xf32>
    %24 = tpu.matmul %23, %2, %cst_16 {dimension_numbers = #tpu.dot_dimension_numbers<[1], [0], [0], [1], [0, 0, 1, 1], [], []>} : vector<128x32xbf16>, vector<32x128xbf16>, vector<128x128xf32> -> vector<128x128xf32>
    %25 = arith.addf %24, %11 : vector<128x128xf32>
    %c0_17 = arith.constant 0 : index
    %c0_18 = arith.constant 0 : index
    %26 = vector.load %arg7[%c0_17, %c0_18] : memref<128x128xf32, #tpu.memory_space<vmem>>, vector<128x128xf32>
    tpu.vector_store %arg7[%c0_17, %c0_18], %25 {strides = array<i32>} : memref<128x128xf32, #tpu.memory_space<vmem>>, vector<128x128xf32>,
    return
  }
}

</mosaic_0001>

<bundles_post_ra>
// kernel: _lambda_.1
= control target key start
LH: loop header
LB: loop body
LE: loop exit
PB: predicated region body
PF: predicated region fallthrough
CT: control target
= control target key end

     0   :  { %vm106_vm0 = vcmask 1041408   ;;  %vm81_vm1 = vcmask 31744   ;;  %vm243_vm2 = vcmask 261120   ;;  %s852_s1 = inlined_call_operand.vmem [shape: bf16[4,32], index: 1, kind: input, shape index: {}]   ;;  %s853_s0 = inlined_call_operand.vmem [shape: f32[128,4], index: 0, kind: input, shape index: {}]   ;;  %s854_s3 = inlined_call_operand.vmem [shape: bf16[32,32], index: 3, kind: input, shape index: {}]   ;;  %s855_s5 = inlined_call_operand.vmem [shape: bf16[32,128], index: 5, kind: input, shape index: {}]   ;;  %s856_s2 = inlined_call_operand.vmem [shape: f32[1,32], index: 2, kind: input, shape index: {}]   ;;  %s857_s4 = inlined_call_operand.vmem [shape: f32[1,32], index: 4, kind: input, shape index: {}]   ;;  %s858_s6 = inlined_call_operand.vmem [shape: f32[1,128], index: 6, kind: input, shape index: {}]   ;;  %s859_s7 = inlined_call_operand.vmem [shape: f32[128,128], index: 7, kind: output, shape index: {}]  }
   0x1   :  { %v27_v0 = vld [vmem:[%s852_s1] sm:$0x3]  ;;  %v58_v2 = vld [vmem:[%s853_s0 + $0x8] sm:$0xff]  ;;  %v59_v5 = vld [vmem:[%s853_s0 + $0x10] sm:$0xff] }
   0x2   :  { %v57_v1 = vld [vmem:[%s853_s0] sm:$0xff]  ;;  %662 = vmatprep.subr.msk.bf16.mxu0 %vm106_vm0, %v27_v0  ;;  %v108_v3 = vsel %vm106_vm0, %v27_v0, 0  ;;  %v60_v6 = vld [vmem:[%s853_s0 + $0x18] sm:$0xff]  ;;  %663 = vmatprep.subr.msk.bf16.mxu1 %vm106_vm0, %v27_v0  ;;  %v62_v9 = vld [vmem:[%s853_s0 + $0x28] sm:$0xff] }
   0x3   :  { %v73_v4 = vpack.c.bf16 %v58_v2, %v57_v1  ;;  %v61_v7 = vld [vmem:[%s853_s0 + $0x20] sm:$0xff]  ;;  %603 = vmatpush3.bf16.msra.mxu0 %v108_v3  ;;  %v74_v8 = vpack.c.bf16 %v60_v6, %v59_v5  ;;  %661 = vmatpush3.bf16.msra.mxu1 %v108_v3  ;;  %v66_v12 = vld [vmem:[%s853_s0 + $0x48] sm:$0xff]  ;;  %v67_v13 = vld [vmem:[%s853_s0 + $0x50] sm:$0xff] }
   0x4   :  { %v75_v10 = vpack.c.bf16 %v62_v9, %v61_v7  ;;  %v65_v11 = vld [vmem:[%s853_s0 + $0x40] sm:$0xff]  ;;  %v68_v15 = vld [vmem:[%s853_s0 + $0x58] sm:$0xff]  ;;  %v70_v17 = vld [vmem:[%s853_s0 + $0x68] sm:$0xff] }
   0x5   :  { %604 = vmatprep.mubr.msk.bf16.mxu0 %vm81_vm1, %v73_v4  ;;  %v77_v14 = vpack.c.bf16 %v66_v12, %v65_v11  ;;  %v69_v16 = vld [vmem:[%s853_s0 + $0x60] sm:$0xff]  ;;  %v63_v18 = vld [vmem:[%s853_s0 + $0x30] sm:$0xff]  ;;  %v64_v19 = vld [vmem:[%s853_s0 + $0x38] sm:$0xff]  ;;  %v78_v20 = vpack.c.bf16 %v68_v15, %v67_v13 }
   0x6   :  { %605 = vmatmul.mubr.msk.bf16.vlgmr.msra.gmra.mrb[0].mxu0 %vm81_vm1, %v74_v8  ;;  %v79_v21 = vpack.c.bf16 %v70_v17, %v69_v16  ;;  %v664_v22 = vld [vmem:[%s854_s3] sm:$0xff]   ;;  %v71_v23 = vld [vmem:[%s853_s0 + $0x70] sm:$0xff]  ;;  %v72_v24 = vld [vmem:[%s853_s0 + $0x78] sm:$0xff]  ;;  %v76_v25 = vpack.c.bf16 %v64_v19, %v63_v18 }
   0x7   :  { %608 = vmatprep.mubr.msk.bf16.mxu0 %vm81_vm1, %v75_v10  ;;  %612 = vmatprep.mubr.msk.bf16.mxu1 %vm81_vm1, %v77_v14  ;;  %v80_v26 = vpack.c.bf16 %v72_v24, %v71_v23  ;;  %v665_v27 = vld [vmem:[%s854_s3 + $0x8] sm:$0xff]   ;;  %v666_v28 = vld [vmem:[%s855_s5] sm:$0xff]  }
   0x8   :  { %613 = vmatmul.mubr.msk.bf16.vlgmr.msra.gmra.mrb[0].mxu1 %vm81_vm1, %v78_v20  ;;  %620 = vmatprep.subr.bf16.mxu1 %v664_v22  ;;  %v542_v29 = vld [vmem:[%s856_s2] ss:$0 sm:$0xff] }
   0x9   :  { %616 = vmatprep.mubr.msk.bf16.mxu1 %vm81_vm1, %v79_v21  ;;  %621 = vmatpush3.bf16.msra.mxu1 %v664_v22  ;;  %v667_v22 = vld [vmem:[%s855_s5 + $0x8] sm:$0xff]   ;;  %v543_v23 = vld [vmem:[%s857_s4] ss:$0 sm:$0xff] }
   0xa   :  { %622 = vmatprep.subr.bf16.mxu1 %v665_v27  ;;  %640 = vmatprep.subr.bf16.mxu0 %v666_v28 }
   0xb   :  { %641 = vmatpush3.bf16.msra.mxu0 %v666_v28 }
   0xc   :  { %642 = vmatprep.subr.bf16.mxu0 %v667_v22 }
   0xd   :  { %623 = vmatpush3.bf16.msra.mxu1 %v665_v27 }
   0xe   :  { %609 = vmatmul.mubr.msk.bf16.gmra.mrb[4].mxu0 %vm81_vm1, %v76_v25 }
   0xf   :  { %643 = vmatpush3.bf16.msra.mxu0 %v667_v22 }
  0x10   :  { %617 = vmatmul.mubr.msk.bf16.gmra.mrb[4].mxu1 %vm81_vm1, %v80_v26 }
  0xd9   :  { %v606_v30 = vpop.f32.mrb[0].mxu0 }
  0xda   :  { %v153_v31 = vadd.f32 %v606_v30, %v542_v29  ;;  %v144_v32 = vpop.f32.mrb[1].mxu0 }
  0xdb   :  { %v145_v33 = vadd.f32 %v542_v29, %v144_v32  ;;  %v607_v34 = vpop.f32.mrb[2].mxu0  ;;  %v614_v35 = vpop.f32.mrb[0].mxu1 }
  0xdc   :  { %v156_v36 = vadd.f32 %v607_v34, %v542_v29  ;;  %v147_v37 = vpop.f32.mrb[3].mxu0  ;;  %v185_v38 = vadd.f32 %v614_v35, %v542_v29  ;;  %v176_v39 = vpop.f32.mrb[1].mxu1  ;;  %v209_v43 = vmax.f32 %v153_v31, 0.0 }
  0xdd   :  { %v148_v40 = vadd.f32 %v542_v29, %v147_v37  ;;  %v177_v41 = vadd.f32 %v542_v29, %v176_v39  ;;  %v615_v42 = vpop.f32.mrb[2].mxu1  ;;  %v207_v48 = vmax.f32 %v145_v33, 0.0 }
  0xde   :  { %v210_v44 = vmax.f32 %v156_v36, 0.0  ;;  %v217_v45 = vmax.f32 %v185_v38, 0.0  ;;  %v188_v46 = vadd.f32 %v615_v42, %v542_v29  ;;  %v179_v47 = vpop.f32.mrb[3].mxu1 }
  0xdf   :  { %v208_v49 = vmax.f32 %v148_v40, 0.0  ;;  %v215_v50 = vmax.f32 %v177_v41, 0.0  ;;  %v180_v51 = vadd.f32 %v542_v29, %v179_v47 }
  0xe0   :  { %v224_v52 = vpack.c.bf16 %v210_v44, %v209_v43  ;;  %v218_v53 = vmax.f32 %v188_v46, 0.0 }
  0xe1   :  { %v223_v54 = vpack.c.bf16 %v208_v49, %v207_v48  ;;  %v610_v55 = vpop.f32.mrb[4].mxu0  ;;  %v216_v56 = vmax.f32 %v180_v51, 0.0 }
  0xe2   :  { %v169_v57 = vadd.f32 %v610_v55, %v542_v29  ;;  %v160_v58 = vpop.f32.mrb[5].mxu0  ;;  %v228_v59 = vpack.c.bf16 %v218_v53, %v217_v45 }
  0xe3   :  { %v161_v60 = vadd.f32 %v542_v29, %v160_v58  ;;  %v611_v61 = vpop.f32.mrb[6].mxu0  ;;  %624 = vmatprep.mubr.msk.bf16.mxu1 %vm243_vm2, %v223_v54  ;;  %v227_v62 = vpack.c.bf16 %v216_v56, %v215_v50  ;;  %v618_v63 = vpop.f32.mrb[4].mxu1 }
  0xe4   :  { %v172_v0 = vadd.f32 %v611_v61, %v542_v29  ;;  %v163_v1 = vpop.f32.mrb[7].mxu0  ;;  %625 = vmatmul.mubr.msk.bf16.vlgmr.msra.gmra.mrb[8].mxu1 %vm243_vm2, %v224_v52  ;;  %v201_v2 = vadd.f32 %v618_v63, %v542_v29  ;;  %v192_v3 = vpop.f32.mrb[5].mxu1  ;;  %v213_v7 = vmax.f32 %v169_v57, 0.0 }
  0xe5   :  { %v164_v4 = vadd.f32 %v542_v29, %v163_v1  ;;  %v193_v5 = vadd.f32 %v542_v29, %v192_v3  ;;  %v619_v6 = vpop.f32.mrb[6].mxu1  ;;  %v211_v12 = vmax.f32 %v161_v60, 0.0 }
  0xe6   :  { %v214_v8 = vmax.f32 %v172_v0, 0.0  ;;  %v221_v9 = vmax.f32 %v201_v2, 0.0  ;;  %v204_v10 = vadd.f32 %v619_v6, %v542_v29  ;;  %v195_v11 = vpop.f32.mrb[7].mxu1 }
  0xe7   :  { %v212_v13 = vmax.f32 %v164_v4, 0.0  ;;  %v219_v14 = vmax.f32 %v193_v5, 0.0  ;;  %v196_v15 = vadd.f32 %v542_v29, %v195_v11 }
  0xe8   :  { %v226_v16 = vpack.c.bf16 %v214_v8, %v213_v7  ;;  %v222_v17 = vmax.f32 %v204_v10, 0.0 }
  0xe9   :  { %v225_v18 = vpack.c.bf16 %v212_v13, %v211_v12  ;;  %v220_v19 = vmax.f32 %v196_v15, 0.0 }
  0xea   :  { %v230_v20 = vpack.c.bf16 %v222_v17, %v221_v9 }
  0xeb   :  { %628 = vmatprep.mubr.msk.bf16.mxu1 %vm243_vm2, %v225_v18  ;;  %v229_v21 = vpack.c.bf16 %v220_v19, %v219_v14 }
  0xec   :  { %629 = vmatmul.mubr.msk.bf16.gmra.mrb[12].mxu1 %vm243_vm2, %v226_v16  ;;  %v544_v16 = vld [vmem:[%s858_s6] ss:$0 sm:$0xff] }
  0xed   :  { %632 = vmatprep.mubr.msk.bf16.mxu1 %vm243_vm2, %v227_v62 }
  0xf4   :  { %633 = vmatmul.mubr.msk.bf16.gmra.mrb[16].mxu1 %vm243_vm2, %v228_v59 }
  0xf5   :  { %636 = vmatprep.mubr.msk.bf16.mxu1 %vm243_vm2, %v229_v21 }
  0xfc   :  { %637 = vmatmul.mubr.msk.bf16.gmra.mrb[20].mxu1 %vm243_vm2, %v230_v20 }
 0x1b7   :  { %v626_v24 = vpop.f32.mrb[8].mxu1 }
 0x1b8   :  { %v311_v25 = vadd.f32 %v626_v24, %v543_v23  ;;  %v302_v26 = vpop.f32.mrb[9].mxu1 }
 0x1b9   :  { %v303_v27 = vadd.f32 %v543_v23, %v302_v26  ;;  %v627_v28 = vpop.f32.mrb[10].mxu1 }
 0x1ba   :  { %v314_v29 = vadd.f32 %v627_v28, %v543_v23  ;;  %v305_v30 = vpop.f32.mrb[11].mxu1  ;;  %v367_v32 = vmax.f32 %v311_v25, 0.0 }
 0x1bb   :  { %v306_v31 = vadd.f32 %v543_v23, %v305_v30  ;;  %v365_v34 = vmax.f32 %v303_v27, 0.0 }
 0x1bc   :  { %v368_v33 = vmax.f32 %v314_v29, 0.0 }
 0x1bd   :  { %v366_v35 = vmax.f32 %v306_v31, 0.0 }
 0x1be   :  { %v382_v36 = vpack.c.bf16 %v368_v33, %v367_v32 }
 0x1bf   :  { %v381_v37 = vpack.c.bf16 %v366_v35, %v365_v34  ;;  %v630_v38 = vpop.f32.mrb[12].mxu1 }
 0x1c0   :  { %v327_v39 = vadd.f32 %v630_v38, %v543_v23  ;;  %v318_v40 = vpop.f32.mrb[13].mxu1 }
 0x1c1   :  { %v319_v41 = vadd.f32 %v543_v23, %v318_v40  ;;  %v631_v42 = vpop.f32.mrb[14].mxu1  ;;  %644 = vmatprep.mubr.msk.bf16.mxu0 %vm243_vm2, %v381_v37 }
 0x1c2   :  { %v330_v43 = vadd.f32 %v631_v42, %v543_v23  ;;  %v321_v44 = vpop.f32.mrb[15].mxu1  ;;  %645 = vmatmul.mubr.msk.bf16.vlgmr.msra.gmra.mrb[8].mxu0 %vm243_vm2, %v382_v36  ;;  %v371_v46 = vmax.f32 %v327_v39, 0.0 }
 0x1c3   :  { %v322_v45 = vadd.f32 %v543_v23, %v321_v44  ;;  %v369_v48 = vmax.f32 %v319_v41, 0.0 }
 0x1c4   :  { %v372_v47 = vmax.f32 %v330_v43, 0.0 }
 0x1c5   :  { %v370_v49 = vmax.f32 %v322_v45, 0.0 }
 0x1c6   :  { %v384_v50 = vpack.c.bf16 %v372_v47, %v371_v46 }
 0x1c7   :  { %v383_v51 = vpack.c.bf16 %v370_v49, %v369_v48  ;;  %v634_v52 = vpop.f32.mrb[16].mxu1 }
 0x1c8   :  { %v343_v53 = vadd.f32 %v634_v52, %v543_v23  ;;  %v334_v54 = vpop.f32.mrb[17].mxu1 }
 0x1c9   :  { %v335_v55 = vadd.f32 %v543_v23, %v334_v54  ;;  %v635_v56 = vpop.f32.mrb[18].mxu1  ;;  %648 = vmatprep.mubr.msk.bf16.mxu0 %vm243_vm2, %v383_v51 }
 0x1ca   :  { %v346_v57 = vadd.f32 %v635_v56, %v543_v23  ;;  %v337_v58 = vpop.f32.mrb[19].mxu1  ;;  %649 = vmatmul.mubr.msk.bf16.gmra.mrb[12].mxu0 %vm243_vm2, %v384_v50  ;;  %v375_v60 = vmax.f32 %v343_v53, 0.0 }
 0x1cb   :  { %v338_v59 = vadd.f32 %v543_v23, %v337_v58  ;;  %v373_v62 = vmax.f32 %v335_v55, 0.0 }
 0x1cc   :  { %v376_v61 = vmax.f32 %v346_v57, 0.0 }
 0x1cd   :  { %v374_v63 = vmax.f32 %v338_v59, 0.0 }
 0x1ce   :  { %v386_v0 = vpack.c.bf16 %v376_v61, %v375_v60 }
 0x1cf   :  { %v385_v1 = vpack.c.bf16 %v374_v63, %v373_v62  ;;  %v638_v2 = vpop.f32.mrb[20].mxu1 }
 0x1d0   :  { %v359_v3 = vadd.f32 %v638_v2, %v543_v23  ;;  %v350_v4 = vpop.f32.mrb[21].mxu1 }
 0x1d1   :  { %v351_v5 = vadd.f32 %v543_v23, %v350_v4  ;;  %v639_v6 = vpop.f32.mrb[22].mxu1  ;;  %652 = vmatprep.mubr.msk.bf16.mxu0 %vm243_vm2, %v385_v1 }
 0x1d2   :  { %v362_v7 = vadd.f32 %v639_v6, %v543_v23  ;;  %v353_v8 = vpop.f32.mrb[23].mxu1  ;;  %653 = vmatmul.mubr.msk.bf16.gmra.mrb[16].mxu0 %vm243_vm2, %v386_v0  ;;  %v379_v10 = vmax.f32 %v359_v3, 0.0 }
 0x1d3   :  { %v354_v9 = vadd.f32 %v543_v23, %v353_v8  ;;  %v377_v12 = vmax.f32 %v351_v5, 0.0 }
 0x1d4   :  { %v380_v11 = vmax.f32 %v362_v7, 0.0 }
 0x1d5   :  { %v378_v13 = vmax.f32 %v354_v9, 0.0 }
 0x1d6   :  { %v388_v14 = vpack.c.bf16 %v380_v11, %v379_v10 }
 0x1d7   :  { %v387_v15 = vpack.c.bf16 %v378_v13, %v377_v12 }
 0x1d9   :  { %656 = vmatprep.mubr.msk.bf16.mxu0 %vm243_vm2, %v387_v15 }
 0x1da   :  { %657 = vmatmul.mubr.msk.bf16.gmra.mrb[20].mxu0 %vm243_vm2, %v388_v14 }
 0x295   :  { %v646_v17 = vpop.f32.mrb[8].mxu0 }
 0x296   :  { %v468_v18 = vadd.f32 %v646_v17, %v544_v16  ;;  %v459_v19 = vpop.f32.mrb[9].mxu0 }
 0x297   :  { %v460_v20 = vadd.f32 %v544_v16, %v459_v19  ;;  %v647_v21 = vpop.f32.mrb[10].mxu0 }
 0x298   :  { %524 = vst [vmem:[%s859_s7 + $0x10] sm:$0xff] %v468_v18  ;;  %v471_v22 = vadd.f32 %v647_v21, %v544_v16  ;;  %v462_v23 = vpop.f32.mrb[11].mxu0 }
 0x299   :  { %522 = vst [vmem:[%s859_s7] sm:$0xff] %v460_v20  ;;  %v463_v24 = vadd.f32 %v544_v16, %v462_v23 }
 0x29a   :  { %525 = vst [vmem:[%s859_s7 + $0x18] sm:$0xff] %v471_v22 }
 0x29b   :  { %523 = vst [vmem:[%s859_s7 + $0x8] sm:$0xff] %v463_v24 }
 0x29d   :  { %v650_v25 = vpop.f32.mrb[12].mxu0 }
 0x29e   :  { %v484_v26 = vadd.f32 %v650_v25, %v544_v16  ;;  %v475_v27 = vpop.f32.mrb[13].mxu0 }
 0x29f   :  { %v476_v28 = vadd.f32 %v544_v16, %v475_v27  ;;  %v651_v29 = vpop.f32.mrb[14].mxu0 }
 0x2a0   :  { %528 = vst [vmem:[%s859_s7 + $0x30] sm:$0xff] %v484_v26  ;;  %v487_v30 = vadd.f32 %v651_v29, %v544_v16  ;;  %v478_v31 = vpop.f32.mrb[15].mxu0 }
 0x2a1   :  { %526 = vst [vmem:[%s859_s7 + $0x20] sm:$0xff] %v476_v28  ;;  %v479_v32 = vadd.f32 %v544_v16, %v478_v31 }
 0x2a2   :  { %529 = vst [vmem:[%s859_s7 + $0x38] sm:$0xff] %v487_v30 }
 0x2a3   :  { %527 = vst [vmem:[%s859_s7 + $0x28] sm:$0xff] %v479_v32 }
 0x2a5   :  { %v654_v33 = vpop.f32.mrb[16].mxu0 }
 0x2a6   :  { %v500_v34 = vadd.f32 %v654_v33, %v544_v16  ;;  %v491_v35 = vpop.f32.mrb[17].mxu0 }
 0x2a7   :  { %v492_v36 = vadd.f32 %v544_v16, %v491_v35  ;;  %v655_v37 = vpop.f32.mrb[18].mxu0 }
 0x2a8   :  { %532 = vst [vmem:[%s859_s7 + $0x50] sm:$0xff] %v500_v34  ;;  %v503_v38 = vadd.f32 %v655_v37, %v544_v16  ;;  %v494_v39 = vpop.f32.mrb[19].mxu0 }
 0x2a9   :  { %530 = vst [vmem:[%s859_s7 + $0x40] sm:$0xff] %v492_v36  ;;  %v495_v40 = vadd.f32 %v544_v16, %v494_v39 }
 0x2aa   :  { %533 = vst [vmem:[%s859_s7 + $0x58] sm:$0xff] %v503_v38 }
 0x2ab   :  { %531 = vst [vmem:[%s859_s7 + $0x48] sm:$0xff] %v495_v40 }
 0x2ad   :  { %v658_v41 = vpop.f32.mrb[20].mxu0 }
 0x2ae   :  { %v516_v42 = vadd.f32 %v658_v41, %v544_v16  ;;  %v507_v43 = vpop.f32.mrb[21].mxu0 }
 0x2af   :  { %v508_v44 = vadd.f32 %v544_v16, %v507_v43  ;;  %v659_v45 = vpop.f32.mrb[22].mxu0 }
 0x2b0   :  { %536 = vst [vmem:[%s859_s7 + $0x70] sm:$0xff] %v516_v42  ;;  %v519_v46 = vadd.f32 %v659_v45, %v544_v16  ;;  %v510_v47 = vpop.f32.mrb[23].mxu0 }
 0x2b1   :  { %534 = vst [vmem:[%s859_s7 + $0x60] sm:$0xff] %v508_v44  ;;  %v511_v48 = vadd.f32 %v544_v16, %v510_v47 }
 0x2b2   :  { %537 = vst [vmem:[%s859_s7 + $0x78] sm:$0xff] %v519_v46 }
 0x2b3   :  { %535 = vst [vmem:[%s859_s7 + $0x68] sm:$0xff] %v511_v48 }

</bundles_post_ra>
